<compile_context>
chip_gen: v7x
topology: tpu7x:2x2x1
jax: 0.10.0
libtpu: 0.0.40
codegen_flags: <defaults>
</compile_context>

<pallas_src>
import functools

import jax
import jax.numpy as jnp
from jax.experimental import pallas as pl
from jax.experimental.pallas import tpu as pltpu


def _rnn_chunk_kernel(xproj_ref, h0_ref, whh_t_ref, b_ref, wd_t_ref, bd_ref,
                      out_ref, hlast_ref, h_scratch, y_scratch):
    """One grid step = T_CHUNK recurrence steps + one batched dense matmul.

    Recurrence (per local step t):
        h = tanh(x_proj[t] + b + h @ W_hh^T)
    where x_proj[t] = one_hot(token_t) @ W_ih^T was precomputed as a gather.
    """
    t_chunk, b_tile, _ = xproj_ref.shape
    c = pl.program_id(0)

    # Load the initial hidden state into the carried scratch on the first chunk.
    @pl.when(c == 0)
    def _():
        h_scratch[...] = h0_ref[...]

    whh_t = whh_t_ref[...]          # (H, H), already transposed in the wrapper
    bias = b_ref[...]               # (1, H) = b_ih + b_hh

    # Fully unrolled recurrence with static indices (t_chunk is small).
    h = h_scratch[...]              # (B_pad, H)
    for t in range(t_chunk):
        pre = xproj_ref[t] + bias + jnp.dot(
            h, whh_t, preferred_element_type=jnp.float32)
        h = jnp.tanh(pre)
        # Stage Y rows at offset t*B_pad (sublane-aligned since B_pad % 8 == 0).
        y_scratch[pl.ds(t * b_tile, b_tile), :] = h
    h_scratch[...] = h              # carry across grid steps

    # Dense head: one (T_CHUNK*B_pad, H) @ (H, V) matmul + single block store.
    logits = jnp.dot(y_scratch[...], wd_t_ref[...],
                     preferred_element_type=jnp.float32) + bd_ref[...]
    out_ref[...] = logits.astype(out_ref.dtype)

    # Final-state output has a constant block index across the (arbitrary) time
    # axis; only write it on the last chunk.  NOTE: this relies on the time
    # axis staying "arbitrary" — do not mark it "parallel".
    @pl.when(c == pl.num_programs(0) - 1)
    def _():
        hlast_ref[...] = h.astype(hlast_ref.dtype)


def _pick_t_chunk(seq_len, max_chunk=8):
    for cand in range(min(seq_len, max_chunk), 0, -1):
        if seq_len % cand == 0:
            return cand
    return 1


@functools.partial(jax.jit, static_argnames=("vocab_size",))
def rnn_model_forward(inputs, state, params, *, vocab_size):
    """inputs: (batch, seq) int32 tokens; state: (1, batch, hidden) float32."""
    w_ih, w_hh, b_ih, b_hh, w_d, b_d = params
    B, S = inputs.shape
    H = w_hh.shape[0]
    V = vocab_size

    t_chunk = _pick_t_chunk(S)
    n_chunks = S // t_chunk
    b_pad = ((B + 7) // 8) * 8      # sublane-align the batch

    # Gather replaces the one-hot matmul: one_hot(x) @ W_ih^T == W_ih^T[x].
    tokens = inputs.T                                   # (S, B)
    x_proj = jnp.take(w_ih.T, tokens, axis=0)           # (S, B, H) f32

    h0 = state[0]                                       # (B, H)
    if b_pad != B:
        x_proj = jnp.pad(x_proj, ((0, 0), (0, b_pad - B), (0, 0)))
        h0 = jnp.pad(h0, ((0, b_pad - B), (0, 0)))

    # Pre-transpose weights and merge biases once in the wrapper.
    whh_t = w_hh.T                                      # (H, H)
    wd_t = w_d.T                                        # (H, V)
    b_rnn = (b_ih + b_hh).reshape(1, H)
    b_d2 = b_d.reshape(1, V)

    logits, h_final = pl.pallas_call(
        _rnn_chunk_kernel,
        out_shape=(
            jax.ShapeDtypeStruct((S * b_pad, V), jnp.float32),  # dense output
            jax.ShapeDtypeStruct((b_pad, H), jnp.float32),      # final hidden
        ),
        grid_spec=pltpu.PrefetchScalarGridSpec(
            num_scalar_prefetch=0,
            grid=(n_chunks,),
            in_specs=[
                pl.BlockSpec((t_chunk, b_pad, H), lambda c: (c, 0, 0)),  # x_proj
                pl.BlockSpec((b_pad, H), lambda c: (0, 0)),              # h0
                pl.BlockSpec((H, H), lambda c: (0, 0)),                  # W_hh^T
                pl.BlockSpec((1, H), lambda c: (0, 0)),                  # b_ih+b_hh
                pl.BlockSpec((H, V), lambda c: (0, 0)),                  # W_d^T
                pl.BlockSpec((1, V), lambda c: (0, 0)),                  # b_d
            ],
            out_specs=[
                pl.BlockSpec((t_chunk * b_pad, V), lambda c: (c, 0)),    # logits
                pl.BlockSpec((b_pad, H), lambda c: (0, 0)),              # h_final
            ],
            scratch_shapes=[
                pltpu.VMEM((b_pad, H), jnp.float32),             # carried h
                pltpu.VMEM((t_chunk * b_pad, H), jnp.float32),   # per-chunk Y
            ],
        ),
        compiler_params=pltpu.CompilerParams(
            dimension_semantics=("arbitrary",)),   # time axis is a recurrence
    )(x_proj, h0, whh_t, b_rnn, wd_t, b_d2)

    # Strip batch padding; row order (t, b) matches torch's Y.view(-1, H).
    output = logits.reshape(S, b_pad, V)[:, :B, :].reshape(S * B, V)
    new_state = h_final[:B][None, :, :]                 # (1, B, H) like nn.RNN
    return output, new_state


def _reference_forward(inputs, state, params, vocab_size):
    """Pure-JAX reference mirroring the PyTorch semantics."""
    w_ih, w_hh, b_ih, b_hh, w_d, b_d = params
    x = jax.nn.one_hot(inputs.T, vocab_size, dtype=jnp.float32)  # (S, B, V)
    h = state[0]
    ys = []
    for t in range(x.shape[0]):
        h = jnp.tanh(x[t] @ w_ih.T + b_ih + h @ w_hh.T + b_hh)
        ys.append(h)
    y = jnp.stack(ys)                                            # (S, B, H)
    out = y.reshape(-1, y.shape[-1]) @ w_d.T + b_d
    return out, h[None]


if __name__ == "__main__":
    B, S, V, H = 4, 16, 32, 32   # batch, seq, vocab_size, hidden_size

    key = jax.random.PRNGKey(0)
    ks = jax.random.split(key, 8)
    bound = 1.0 / (H ** 0.5)
    w_ih = jax.random.uniform(ks[0], (H, V), jnp.float32, -bound, bound)
    w_hh = jax.random.uniform(ks[1], (H, H), jnp.float32, -bound, bound)
    b_ih = jax.random.uniform(ks[2], (H,), jnp.float32, -bound, bound)
    b_hh = jax.random.uniform(ks[3], (H,), jnp.float32, -bound, bound)
    w_d = jax.random.uniform(ks[4], (V, H), jnp.float32, -bound, bound)
    b_d = jax.random.uniform(ks[5], (V,), jnp.float32, -bound, bound)
    params = (w_ih, w_hh, b_ih, b_hh, w_d, b_d)

    inputs = jax.random.randint(ks[6], (B, S), 0, V, dtype=jnp.int32)
    state = 0.1 * jax.random.normal(ks[7], (1, B, H), jnp.float32)

    out, new_state = rnn_model_forward(inputs, state, params, vocab_size=V)
    out = jax.block_until_ready(out)
    new_state = jax.block_until_ready(new_state)

    ref_out, ref_state = _reference_forward(inputs, state, params, V)
    assert out.shape == (S * B, V), out.shape
    assert new_state.shape == (1, B, H), new_state.shape
    assert jnp.allclose(out, ref_out, atol=1e-5, rtol=1e-5), \
        float(jnp.max(jnp.abs(out - ref_out)))
    assert jnp.allclose(new_state, ref_state, atol=1e-5, rtol=1e-5)

    print("KERNEL_OK")
</pallas_src>

<mosaic_0001>
module attributes {stable_mosaic.version = 11 : i64} {
  func.func @_rnn_chunk_kernel(%arg0: i32, %arg1: memref<8x8x32xf32, #tpu.memory_space<vmem>>, %arg2: memref<8x32xf32, #tpu.memory_space<vmem>>, %arg3: memref<32x32xf32, #tpu.memory_space<vmem>>, %arg4: memref<1x32xf32, #tpu.memory_space<vmem>>, %arg5: memref<32x32xf32, #tpu.memory_space<vmem>>, %arg6: memref<1x32xf32, #tpu.memory_space<vmem>>, %arg7: memref<64x32xf32, #tpu.memory_space<vmem>>, %arg8: memref<8x32xf32, #tpu.memory_space<vmem>>, %arg9: memref<8x32xf32, #tpu.memory_space<vmem>>, %arg10: memref<64x32xf32, #tpu.memory_space<vmem>>) attributes {dimension_semantics = [#tpu.dimension_semantics<arbitrary>], iteration_bounds = array<i64: 2>, scalar_prefetch = 0 : i64, scratch_operands = 2 : i64, tpu.core_type = #tpu.core_type<tc>, window_params = [{transform_indices = @transform_0, window_bounds = array<i64: 8, 8, 32>}, {pipeline_mode = #tpu.pipeline_mode<synchronous>, transform_indices = @transform_1, window_bounds = array<i64: 8, 32>}, {pipeline_mode = #tpu.pipeline_mode<synchronous>, transform_indices = @transform_2, window_bounds = array<i64: 32, 32>}, {pipeline_mode = #tpu.pipeline_mode<synchronous>, transform_indices = @transform_3, window_bounds = array<i64: 1, 32>}, {pipeline_mode = #tpu.pipeline_mode<synchronous>, transform_indices = @transform_4, window_bounds = array<i64: 32, 32>}, {pipeline_mode = #tpu.pipeline_mode<synchronous>, transform_indices = @transform_5, window_bounds = array<i64: 1, 32>}, {transform_indices = @transform_6, window_bounds = array<i64: 64, 32>}, {pipeline_mode = #tpu.pipeline_mode<synchronous>, transform_indices = @transform_7, window_bounds = array<i64: 8, 32>}]} {
    %c0_i32 = arith.constant 0 : i32
    %0 = arith.cmpi eq, %arg0, %c0_i32 : i32
    %1 = arith.extui %0 : i1 to i32
    %c0_i32_0 = arith.constant 0 : i32
    %2 = arith.cmpi ne, %1, %c0_i32_0 : i32
    scf.if %2 {
      %c0_51 = arith.constant 0 : index
      %c0_52 = arith.constant 0 : index
      %81 = vector.load %arg2[%c0_51, %c0_52] : memref<8x32xf32, #tpu.memory_space<vmem>>, vector<8x32xf32>
      %c0_53 = arith.constant 0 : index
      %c0_54 = arith.constant 0 : index
      %82 = vector.load %arg9[%c0_53, %c0_54] : memref<8x32xf32, #tpu.memory_space<vmem>>, vector<8x32xf32>
      tpu.vector_store %arg9[%c0_53, %c0_54], %81 {strides = array<i32>} : memref<8x32xf32, #tpu.memory_space<vmem>>, vector<8x32xf32>,
    } else {
    }
    %c0 = arith.constant 0 : index
    %c0_1 = arith.constant 0 : index
    %3 = vector.load %arg3[%c0, %c0_1] : memref<32x32xf32, #tpu.memory_space<vmem>>, vector<32x32xf32>
    %c0_2 = arith.constant 0 : index
    %c0_3 = arith.constant 0 : index
    %4 = vector.load %arg4[%c0_2, %c0_3] : memref<1x32xf32, #tpu.memory_space<vmem>>, vector<1x32xf32>
    %c0_4 = arith.constant 0 : index
    %c0_5 = arith.constant 0 : index
    %5 = vector.load %arg9[%c0_4, %c0_5] : memref<8x32xf32, #tpu.memory_space<vmem>>, vector<8x32xf32>
    %c0_6 = arith.constant 0 : index
    %c0_7 = arith.constant 0 : index
    %c0_8 = arith.constant 0 : index
    %6 = vector.load %arg1[%c0_6, %c0_7, %c0_8] : memref<8x8x32xf32, #tpu.memory_space<vmem>>, vector<1x8x32xf32>
    %7 = vector.shape_cast %6 : vector<1x8x32xf32> to vector<8x32xf32>
    %8 = vector.broadcast %4 : vector<1x32xf32> to vector<8x32xf32>
    %9 = arith.addf %7, %8 : vector<8x32xf32>
    %cst = arith.constant dense<0.000000e+00> : vector<8x32xf32>
    %10 = tpu.matmul %5, %3, %cst {dimension_numbers = #tpu.dot_dimension_numbers<[1], [0], [0], [1], [0, 0, 1, 1], [], []>} : vector<8x32xf32>, vector<32x32xf32>, vector<8x32xf32> -> vector<8x32xf32>
    %11 = arith.addf %9, %10 : vector<8x32xf32>
    %12 = math.tanh %11 : vector<8x32xf32>
    %c0_9 = arith.constant 0 : index
    %c0_10 = arith.constant 0 : index
    %13 = vector.load %arg10[%c0_9, %c0_10] : memref<64x32xf32, #tpu.memory_space<vmem>>, vector<8x32xf32>
    tpu.vector_store %arg10[%c0_9, %c0_10], %12 {strides = array<i32>} : memref<64x32xf32, #tpu.memory_space<vmem>>, vector<8x32xf32>,
    %c1 = arith.constant 1 : index
    %c0_11 = arith.constant 0 : index
    %c0_12 = arith.constant 0 : index
    %14 = vector.load %arg1[%c1, %c0_11, %c0_12] : memref<8x8x32xf32, #tpu.memory_space<vmem>>, vector<1x8x32xf32>
    %15 = vector.shape_cast %14 : vector<1x8x32xf32> to vector<8x32xf32>
    %16 = vector.broadcast %4 : vector<1x32xf32> to vector<8x32xf32>
    %17 = arith.addf %15, %16 : vector<8x32xf32>
    %cst_13 = arith.constant dense<0.000000e+00> : vector<8x32xf32>
    %18 = tpu.matmul %12, %3, %cst_13 {dimension_numbers = #tpu.dot_dimension_numbers<[1], [0], [0], [1], [0, 0, 1, 1], [], []>} : vector<8x32xf32>, vector<32x32xf32>, vector<8x32xf32> -> vector<8x32xf32>
    %19 = arith.addf %17, %18 : vector<8x32xf32>
    %20 = math.tanh %19 : vector<8x32xf32>
    %c8 = arith.constant 8 : index
    %c0_14 = arith.constant 0 : index
    %21 = vector.load %arg10[%c8, %c0_14] : memref<64x32xf32, #tpu.memory_space<vmem>>, vector<8x32xf32>
    tpu.vector_store %arg10[%c8, %c0_14], %20 {strides = array<i32>} : memref<64x32xf32, #tpu.memory_space<vmem>>, vector<8x32xf32>,
    %c2 = arith.constant 2 : index
    %c0_15 = arith.constant 0 : index
    %c0_16 = arith.constant 0 : index
    %22 = vector.load %arg1[%c2, %c0_15, %c0_16] : memref<8x8x32xf32, #tpu.memory_space<vmem>>, vector<1x8x32xf32>
    %23 = vector.shape_cast %22 : vector<1x8x32xf32> to vector<8x32xf32>
    %24 = vector.broadcast %4 : vector<1x32xf32> to vector<8x32xf32>
    %25 = arith.addf %23, %24 : vector<8x32xf32>
    %cst_17 = arith.constant dense<0.000000e+00> : vector<8x32xf32>
    %26 = tpu.matmul %20, %3, %cst_17 {dimension_numbers = #tpu.dot_dimension_numbers<[1], [0], [0], [1], [0, 0, 1, 1], [], []>} : vector<8x32xf32>, vector<32x32xf32>, vector<8x32xf32> -> vector<8x32xf32>
    %27 = arith.addf %25, %26 : vector<8x32xf32>
    %28 = math.tanh %27 : vector<8x32xf32>
    %c16 = arith.constant 16 : index
    %c0_18 = arith.constant 0 : index
    %29 = vector.load %arg10[%c16, %c0_18] : memref<64x32xf32, #tpu.memory_space<vmem>>, vector<8x32xf32>
    tpu.vector_store %arg10[%c16, %c0_18], %28 {strides = array<i32>} : memref<64x32xf32, #tpu.memory_space<vmem>>, vector<8x32xf32>,
    %c3 = arith.constant 3 : index
    %c0_19 = arith.constant 0 : index
    %c0_20 = arith.constant 0 : index
    %30 = vector.load %arg1[%c3, %c0_19, %c0_20] : memref<8x8x32xf32, #tpu.memory_space<vmem>>, vector<1x8x32xf32>
    %31 = vector.shape_cast %30 : vector<1x8x32xf32> to vector<8x32xf32>
    %32 = vector.broadcast %4 : vector<1x32xf32> to vector<8x32xf32>
    %33 = arith.addf %31, %32 : vector<8x32xf32>
    %cst_21 = arith.constant dense<0.000000e+00> : vector<8x32xf32>
    %34 = tpu.matmul %28, %3, %cst_21 {dimension_numbers = #tpu.dot_dimension_numbers<[1], [0], [0], [1], [0, 0, 1, 1], [], []>} : vector<8x32xf32>, vector<32x32xf32>, vector<8x32xf32> -> vector<8x32xf32>
    %35 = arith.addf %33, %34 : vector<8x32xf32>
    %36 = math.tanh %35 : vector<8x32xf32>
    %c24 = arith.constant 24 : index
    %c0_22 = arith.constant 0 : index
    %37 = vector.load %arg10[%c24, %c0_22] : memref<64x32xf32, #tpu.memory_space<vmem>>, vector<8x32xf32>
    tpu.vector_store %arg10[%c24, %c0_22], %36 {strides = array<i32>} : memref<64x32xf32, #tpu.memory_space<vmem>>, vector<8x32xf32>,
    %c4 = arith.constant 4 : index
    %c0_23 = arith.constant 0 : index
    %c0_24 = arith.constant 0 : index
    %38 = vector.load %arg1[%c4, %c0_23, %c0_24] : memref<8x8x32xf32, #tpu.memory_space<vmem>>, vector<1x8x32xf32>
    %39 = vector.shape_cast %38 : vector<1x8x32xf32> to vector<8x32xf32>
    %40 = vector.broadcast %4 : vector<1x32xf32> to vector<8x32xf32>
    %41 = arith.addf %39, %40 : vector<8x32xf32>
    %cst_25 = arith.constant dense<0.000000e+00> : vector<8x32xf32>
    %42 = tpu.matmul %36, %3, %cst_25 {dimension_numbers = #tpu.dot_dimension_numbers<[1], [0], [0], [1], [0, 0, 1, 1], [], []>} : vector<8x32xf32>, vector<32x32xf32>, vector<8x32xf32> -> vector<8x32xf32>
    %43 = arith.addf %41, %42 : vector<8x32xf32>
    %44 = math.tanh %43 : vector<8x32xf32>
    %c32 = arith.constant 32 : index
    %c0_26 = arith.constant 0 : index
    %45 = vector.load %arg10[%c32, %c0_26] : memref<64x32xf32, #tpu.memory_space<vmem>>, vector<8x32xf32>
    tpu.vector_store %arg10[%c32, %c0_26], %44 {strides = array<i32>} : memref<64x32xf32, #tpu.memory_space<vmem>>, vector<8x32xf32>,
    %c5 = arith.constant 5 : index
    %c0_27 = arith.constant 0 : index
    %c0_28 = arith.constant 0 : index
    %46 = vector.load %arg1[%c5, %c0_27, %c0_28] : memref<8x8x32xf32, #tpu.memory_space<vmem>>, vector<1x8x32xf32>
    %47 = vector.shape_cast %46 : vector<1x8x32xf32> to vector<8x32xf32>
    %48 = vector.broadcast %4 : vector<1x32xf32> to vector<8x32xf32>
    %49 = arith.addf %47, %48 : vector<8x32xf32>
    %cst_29 = arith.constant dense<0.000000e+00> : vector<8x32xf32>
    %50 = tpu.matmul %44, %3, %cst_29 {dimension_numbers = #tpu.dot_dimension_numbers<[1], [0], [0], [1], [0, 0, 1, 1], [], []>} : vector<8x32xf32>, vector<32x32xf32>, vector<8x32xf32> -> vector<8x32xf32>
    %51 = arith.addf %49, %50 : vector<8x32xf32>
    %52 = math.tanh %51 : vector<8x32xf32>
    %c40 = arith.constant 40 : index
    %c0_30 = arith.constant 0 : index
    %53 = vector.load %arg10[%c40, %c0_30] : memref<64x32xf32, #tpu.memory_space<vmem>>, vector<8x32xf32>
    tpu.vector_store %arg10[%c40, %c0_30], %52 {strides = array<i32>} : memref<64x32xf32, #tpu.memory_space<vmem>>, vector<8x32xf32>,
    %c6 = arith.constant 6 : index
    %c0_31 = arith.constant 0 : index
    %c0_32 = arith.constant 0 : index
    %54 = vector.load %arg1[%c6, %c0_31, %c0_32] : memref<8x8x32xf32, #tpu.memory_space<vmem>>, vector<1x8x32xf32>
    %55 = vector.shape_cast %54 : vector<1x8x32xf32> to vector<8x32xf32>
    %56 = vector.broadcast %4 : vector<1x32xf32> to vector<8x32xf32>
    %57 = arith.addf %55, %56 : vector<8x32xf32>
    %cst_33 = arith.constant dense<0.000000e+00> : vector<8x32xf32>
    %58 = tpu.matmul %52, %3, %cst_33 {dimension_numbers = #tpu.dot_dimension_numbers<[1], [0], [0], [1], [0, 0, 1, 1], [], []>} : vector<8x32xf32>, vector<32x32xf32>, vector<8x32xf32> -> vector<8x32xf32>
    %59 = arith.addf %57, %58 : vector<8x32xf32>
    %60 = math.tanh %59 : vector<8x32xf32>
    %c48 = arith.constant 48 : index
    %c0_34 = arith.constant 0 : index
    %61 = vector.load %arg10[%c48, %c0_34] : memref<64x32xf32, #tpu.memory_space<vmem>>, vector<8x32xf32>
    tpu.vector_store %arg10[%c48, %c0_34], %60 {strides = array<i32>} : memref<64x32xf32, #tpu.memory_space<vmem>>, vector<8x32xf32>,
    %c7 = arith.constant 7 : index
    %c0_35 = arith.constant 0 : index
    %c0_36 = arith.constant 0 : index
    %62 = vector.load %arg1[%c7, %c0_35, %c0_36] : memref<8x8x32xf32, #tpu.memory_space<vmem>>, vector<1x8x32xf32>
    %63 = vector.shape_cast %62 : vector<1x8x32xf32> to vector<8x32xf32>
    %64 = vector.broadcast %4 : vector<1x32xf32> to vector<8x32xf32>
    %65 = arith.addf %63, %64 : vector<8x32xf32>
    %cst_37 = arith.constant dense<0.000000e+00> : vector<8x32xf32>
    %66 = tpu.matmul %60, %3, %cst_37 {dimension_numbers = #tpu.dot_dimension_numbers<[1], [0], [0], [1], [0, 0, 1, 1], [], []>} : vector<8x32xf32>, vector<32x32xf32>, vector<8x32xf32> -> vector<8x32xf32>
    %67 = arith.addf %65, %66 : vector<8x32xf32>
    %68 = math.tanh %67 : vector<8x32xf32>
    %c56 = arith.constant 56 : index
    %c0_38 = arith.constant 0 : index
    %69 = vector.load %arg10[%c56, %c0_38] : memref<64x32xf32, #tpu.memory_space<vmem>>, vector<8x32xf32>
    tpu.vector_store %arg10[%c56, %c0_38], %68 {strides = array<i32>} : memref<64x32xf32, #tpu.memory_space<vmem>>, vector<8x32xf32>,
    %c0_39 = arith.constant 0 : index
    %c0_40 = arith.constant 0 : index
    %70 = vector.load %arg9[%c0_39, %c0_40] : memref<8x32xf32, #tpu.memory_space<vmem>>, vector<8x32xf32>
    tpu.vector_store %arg9[%c0_39, %c0_40], %68 {strides = array<i32>} : memref<8x32xf32, #tpu.memory_space<vmem>>, vector<8x32xf32>,
    %c0_41 = arith.constant 0 : index
    %c0_42 = arith.constant 0 : index
    %71 = vector.load %arg10[%c0_41, %c0_42] : memref<64x32xf32, #tpu.memory_space<vmem>>, vector<64x32xf32>
    %c0_43 = arith.constant 0 : index
    %c0_44 = arith.constant 0 : index
    %72 = vector.load %arg5[%c0_43, %c0_44] : memref<32x32xf32, #tpu.memory_space<vmem>>, vector<32x32xf32>
    %cst_45 = arith.constant dense<0.000000e+00> : vector<64x32xf32>
    %73 = tpu.matmul %71, %72, %cst_45 {dimension_numbers = #tpu.dot_dimension_numbers<[1], [0], [0], [1], [0, 0, 1, 1], [], []>} : vector<64x32xf32>, vector<32x32xf32>, vector<64x32xf32> -> vector<64x32xf32>
    %c0_46 = arith.constant 0 : index
    %c0_47 = arith.constant 0 : index
    %74 = vector.load %arg6[%c0_46, %c0_47] : memref<1x32xf32, #tpu.memory_space<vmem>>, vector<1x32xf32>
    %75 = vector.broadcast %74 : vector<1x32xf32> to vector<64x32xf32>
    %76 = arith.addf %73, %75 : vector<64x32xf32>
    %c0_48 = arith.constant 0 : index
    %c0_49 = arith.constant 0 : index
    %77 = vector.load %arg7[%c0_48, %c0_49] : memref<64x32xf32, #tpu.memory_space<vmem>>, vector<64x32xf32>
    tpu.vector_store %arg7[%c0_48, %c0_49], %76 {strides = array<i32>} : memref<64x32xf32, #tpu.memory_space<vmem>>, vector<64x32xf32>,
    %c1_i32 = arith.constant 1 : i32
    %78 = arith.cmpi eq, %arg0, %c1_i32 : i32
    %79 = arith.extui %78 : i1 to i32
    %c0_i32_50 = arith.constant 0 : i32
    %80 = arith.cmpi ne, %79, %c0_i32_50 : i32
    scf.if %80 {
      %c0_51 = arith.constant 0 : index
      %c0_52 = arith.constant 0 : index
      %81 = vector.load %arg8[%c0_51, %c0_52] : memref<8x32xf32, #tpu.memory_space<vmem>>, vector<8x32xf32>
      tpu.vector_store %arg8[%c0_51, %c0_52], %68 {strides = array<i32>} : memref<8x32xf32, #tpu.memory_space<vmem>>, vector<8x32xf32>,
    } else {
    }
    return
  }
  func.func @transform_0(%arg0: i32) -> (i32, i32, i32) {
    %c0_i32 = arith.constant 0 : i32
    %c0_i32_0 = arith.constant 0 : i32
    %c0_i32_1 = arith.constant 0 : i32
    return %arg0, %c0_i32, %c0_i32_0 : i32, i32, i32
  }
  func.func @transform_1(%arg0: i32) -> (i32, i32) {
    %c0_i32 = arith.constant 0 : i32
    %c0_i32_0 = arith.constant 0 : i32
    %c0_i32_1 = arith.constant 0 : i32
    return %c0_i32, %c0_i32_0 : i32, i32
  }
  func.func @transform_2(%arg0: i32) -> (i32, i32) {
    %c0_i32 = arith.constant 0 : i32
    %c0_i32_0 = arith.constant 0 : i32
    %c0_i32_1 = arith.constant 0 : i32
    return %c0_i32, %c0_i32_0 : i32, i32
  }
  func.func @transform_3(%arg0: i32) -> (i32, i32) {
    %c0_i32 = arith.constant 0 : i32
    %c0_i32_0 = arith.constant 0 : i32
    %c0_i32_1 = arith.constant 0 : i32
    return %c0_i32, %c0_i32_0 : i32, i32
  }
  func.func @transform_4(%arg0: i32) -> (i32, i32) {
    %c0_i32 = arith.constant 0 : i32
    %c0_i32_0 = arith.constant 0 : i32
    %c0_i32_1 = arith.constant 0 : i32
    return %c0_i32, %c0_i32_0 : i32, i32
  }
  func.func @transform_5(%arg0: i32) -> (i32, i32) {
    %c0_i32 = arith.constant 0 : i32
    %c0_i32_0 = arith.constant 0 : i32
    %c0_i32_1 = arith.constant 0 : i32
    return %c0_i32, %c0_i32_0 : i32, i32
  }
  func.func @transform_6(%arg0: i32) -> (i32, i32) {
    %c0_i32 = arith.constant 0 : i32
    %c0_i32_0 = arith.constant 0 : i32
    return %arg0, %c0_i32 : i32, i32
  }
  func.func @transform_7(%arg0: i32) -> (i32, i32) {
    %c0_i32 = arith.constant 0 : i32
    %c0_i32_0 = arith.constant 0 : i32
    %c0_i32_1 = arith.constant 0 : i32
    return %c0_i32, %c0_i32_0 : i32, i32
  }
}

</mosaic_0001>

<bundles_post_ra>
// kernel: rnn_model_forward.1
= control target key start
LH: loop header
LB: loop body
LE: loop exit
PB: predicated region body
PF: predicated region fallthrough
CT: control target
= control target key end

     0   :  { %s1487_s24 = smov 0   ;;  %s1661_s0 = inlined_call_operand.vmem [shape: f32[16,8,32], index: 0, kind: input, shape index: {}]   ;;  %s1662_s1 = inlined_call_operand.vmem [shape: f32[8,32], index: 1, kind: input, shape index: {}]   ;;  %s1663_s2 = inlined_call_operand.vmem [shape: f32[32,32], index: 2, kind: input, shape index: {}]   ;;  %s1664_s3 = inlined_call_operand.vmem [shape: f32[1,32], index: 3, kind: input, shape index: {}]   ;;  %s1665_s4 = inlined_call_operand.vmem [shape: f32[32,32], index: 4, kind: input, shape index: {}]   ;;  %s1666_s5 = inlined_call_operand.vmem [shape: f32[1,32], index: 5, kind: input, shape index: {}]   ;;  %s1667_s6 = inlined_call_operand.vmem [shape: f32[128,32], index: 6, kind: output, shape index: {0}]   ;;  %s1668_s7 = inlined_call_operand.vmem [shape: f32[8,32], index: 7, kind: output, shape index: {1}]  }
   0x1 LB: > { %s1493_s25 = sadd.s32 4294967295, %s1442_s24   ;;  %p1159_p0 = scmp.ge.s32.totalorder %s1442_s24, 1  ;;  %s1442_s24 = sphi %s1487_s24, %s18_s24  }
   0x2   : > { %p236_p1 = scmp.lt.s32.totalorder %s1442_s24, 3 }
   0x4   : > { %p237_p2 = pnand %p1159_p0, %p236_p1 }
   0x5   : > { %s1160_s26 = sshll.u32 (!%p237_p2), %s1493_s25, 3  ;;  %p1164_p4 = scmp.ne.s32.totalorder (!%p237_p2), %s1493_s25, 0 }
   0x6   : > { %240 = sbr.rel (%p237_p2) target bundleno = 2054 (0x806), region = 44  ;;  %p269_p3 = scmp.lt.s32.totalorder (!%p237_p2), %s1160_s26, 15 }
   0xd   : > { %s1670_s26 = smov (!%p269_p3, %s1160_s26), 15  ;;  %283 = sbr.rel (%p1164_p4) target bundleno = 20 (0x14), region = 48 }
   0xe   : > { %s1161_s27 = sshll.u32 %s1670_s26, 3  ;;  %v284_v0 = vld [vmem:[%s1662_s1] sm:$0xff] (!%p1164_p4)  ;;  %vm285_vm0 = vcmask (!%p1164_p4), 261120  }
   0xf   : > { %s1501_s30 = scalar_lea.vmem %s1661_s0, %s1161_s27  ;;  %s1506_s10 = scalar_lea.vmem %s1667_s6, %s1161_s27  ;;  %286 = vst.msk [vmem:[#allocation2] sm:$0xff] (!%p1164_p4), %vm285_vm0, %v284_v0 }
  0x14 PF: > { %v287_v1 = vld [vmem:[%s1663_s2] sm:$0xff]  ;;  %v288_v2 = vld [vmem:[%s1663_s2 + $0x8] sm:$0xff]  ;;  %v289_v3 = vld [vmem:[%s1663_s2 + $0x10] sm:$0xff]  ;;  %v1444_v4 = vmov 0.0|0.0   ;;  %vm1445_vm1 = vmmov 0   ;;  %v1446_v7 = vmov 0.0  }
  0x15   : > { %1353 = vmatprep.subr.bf16.mxu1 %v1444_v4  ;;  %v1522_v5 = vpack.c.bf16 %v288_v2, %v287_v1  ;;  %v290_v6 = vld [vmem:[%s1663_s2 + $0x18] sm:$0xff]  ;;  %1253 = vmatprep.mubr.msk.f32.mxu1 %vm1445_vm1, %v1446_v7  ;;  %vm301_vm2 = vcmask 261120   ;;  %v1552_v10 = vld [vmem:[%s1664_s3] ss:$0 sm:$0xff]  ;;  %v1167_v17 = vld [vmem:[%s1501_s30 + $0x8] sm:$0xff]  ;;  %p1190_p5 = scmp.ne.s32.totalorder %s1493_s25, 1 }
  0x16   : > { %1365 = vmatprep.subr.bf16.mxu0 %v1444_v4  ;;  %1275 = vmatprep.mubr.msk.f32.mxu0 %vm1445_vm1, %v1446_v7  ;;  %v1533_v8 = vpack.c.bf16 %v290_v6, %v289_v3  ;;  %v292_v9 = vld [vmem:[#allocation2] sm:$0xff]  ;;  %v380_v18 = vadd.f32 %v1167_v17, %v1552_v10  ;;  %v1169_v23 = vld [vmem:[%s1501_s30 + $0x10] sm:$0xff]  ;;  %v1171_v29 = vld [vmem:[%s1501_s30 + $0x18] sm:$0xff] }
  0x17   : > { %1355 = vmatpush3.bf16.msra.mxu1 %v1522_v5  ;;  %1367 = vmatpush3.bf16.msra.mxu0 %v1522_v5  ;;  %v293_v11 = vld [vmem:[%s1501_s30] sm:$0xff]  ;;  %v459_v24 = vadd.f32 %v1169_v23, %v1552_v10  ;;  %v538_v30 = vadd.f32 %v1171_v29, %v1552_v10  ;;  %v941_v42 = vld [vmem:[%s1665_s4 + $0x8] sm:$0xff]  ;;  %v942_v49 = vld [vmem:[%s1665_s4 + $0x10] sm:$0xff] }
  0x18   : > { %1356 = vmatprep.subr.bf16.mxu1 %v1444_v4  ;;  %1368 = vmatprep.subr.bf16.mxu0 %v1444_v4  ;;  %v300_v12 = vadd.f32 %v1552_v10, %v293_v11  ;;  %v1173_v35 = vld [vmem:[%s1501_s30 + $0x20] sm:$0xff]  ;;  %v1175_v44 = vld [vmem:[%s1501_s30 + $0x28] sm:$0xff]  ;;  %v943_v50 = vld [vmem:[%s1665_s4 + $0x18] sm:$0xff] }
  0x19   : > { %v617_v36 = vadd.f32 %v1173_v35, %v1552_v10  ;;  %v940_v41 = vld [vmem:[%s1665_s4] sm:$0xff]  ;;  %v696_v45 = vadd.f32 %v1175_v44, %v1552_v10  ;;  %v1405_v51 = vpack.c.bf16 %v943_v50, %v942_v49  ;;  %v1177_v59 = vld [vmem:[%s1501_s30 + $0x30] sm:$0xff] }
  0x1a   : > { %v1401_v43 = vpack.c.bf16 %v941_v42, %v940_v41  ;;  %v775_v60 = vadd.f32 %v1177_v59, %v1552_v10  ;;  %v1181_v0 = vld [vmem:[%s1666_s5] ss:$0 sm:$0xff] }
  0x1b   : > { %1358 = vmatpush3.bf16.msra.mxu1 %v1533_v8  ;;  %1370 = vmatpush3.bf16.msra.mxu0 %v1533_v8 }
  0x1c   : > { %1359 = vmatprep.subr.bf16.mxu1 %v1444_v4  ;;  %1377 = vmatprep.subr.bf16.mxu0 %v1444_v4 }
  0x1e   : > { %1254 = vmatmul.mubr.msk.f32.vlgmr.msra.gmra.mrb[0].mxu1 %vm301_vm2, %v292_v9 }
  0x1f   : > { %1361 = vmatpush3.bf16.msra.mxu1 %v1522_v5  ;;  %1264 = vmatprep.mubr.msk.f32.mxu1 %vm1445_vm1, %v1446_v7 }
  0x20   : > { %1362 = vmatprep.subr.bf16.mxu1 %v1444_v4 }
  0x23   : > { %1364 = vmatpush3.bf16.msra.mxu1 %v1533_v8 }
  0x24   : > { %1371 = vmatprep.subr.bf16.mxu1 %v1444_v4 }
  0xf1   : > { %v371_v13 = vpop.f32.mrb[0].mxu1 }
  0xf2   : > { %v375_v14 = vadd.f32 %v371_v13, %v300_v12  ;;  %v1255_v15 = vpop.f32.mrb[1].mxu1 }
  0xf4   : > { %1420 = vtanh.f32 %v375_v14 }
  0xfe   : > { %v1421_v16 = vpop.eup %1420 }
  0xff   : > { %377 = vst.msk [vmem:[#allocation3] sm:$0xff] %vm301_vm2, %v1421_v16  ;;  %1265 = vmatmul.mubr.msk.f32.vlgmr.msra.gmra.mrb[2].mxu1 %vm301_vm2, %v1421_v16  ;;  %v1179_v16 = vld [vmem:[%s1501_s30 + $0x38] sm:$0xff] }
 0x100   : > { %1373 = vmatpush3.bf16.msra.mxu1 %v1522_v5  ;;  %1286 = vmatprep.mubr.msk.f32.mxu1 %vm1445_vm1, %v1446_v7  ;;  %v854_v17 = vadd.f32 %v1179_v16, %v1552_v10 }
 0x101   : > { %1374 = vmatprep.subr.bf16.mxu1 %v1444_v4 }
 0x104   : > { %1376 = vmatpush3.bf16.msra.mxu1 %v1533_v8 }
 0x105   : > { %1383 = vmatprep.subr.bf16.mxu1 %v1444_v4 }
 0x106   : > { %v932_v53 = vld [vmem:[#allocation3] sm:$0xff] }
 0x1d2   : > { %v450_v19 = vpop.f32.mrb[2].mxu1 }
 0x1d3   : > { %v454_v20 = vadd.f32 %v450_v19, %v380_v18  ;;  %v1266_v21 = vpop.f32.mrb[3].mxu1 }
 0x1d5   : > { %1422 = vtanh.f32 %v454_v20 }
 0x1df   : > { %v1423_v22 = vpop.eup %1422 }
 0x1e0   : > { %456 = vst.msk [vmem:[#allocation3 + $0x8] sm:$0xff] %vm301_vm2, %v1423_v22  ;;  %1276 = vmatmul.mubr.msk.f32.vlgmr.msra.gmra.mrb[0].mxu0 %vm301_vm2, %v1423_v22 }
 0x1e1   : > { %1379 = vmatpush3.bf16.msra.mxu0 %v1522_v5  ;;  %1297 = vmatprep.mubr.msk.f32.mxu0 %vm1445_vm1, %v1446_v7 }
 0x1e2   : > { %1380 = vmatprep.subr.bf16.mxu0 %v1444_v4 }
 0x1e5   : > { %1382 = vmatpush3.bf16.msra.mxu0 %v1533_v8 }
 0x1e6   : > { %1389 = vmatprep.subr.bf16.mxu0 %v1444_v4 }
 0x1e7   : > { %v933_v54 = vld [vmem:[#allocation3 + $0x8] sm:$0xff] }
 0x2b3   : > { %v529_v25 = vpop.f32.mrb[0].mxu0 }
 0x2b4   : > { %v533_v26 = vadd.f32 %v529_v25, %v459_v24  ;;  %v1277_v27 = vpop.f32.mrb[1].mxu0 }
 0x2b6   : > { %1424 = vtanh.f32 %v533_v26 }
 0x2c0   : > { %v1425_v28 = vpop.eup %1424 }
 0x2c1   : > { %535 = vst.msk [vmem:[#allocation3 + $0x10] sm:$0xff] %vm301_vm2, %v1425_v28  ;;  %1287 = vmatmul.mubr.msk.f32.vlgmr.msra.gmra.mrb[4].mxu1 %vm301_vm2, %v1425_v28 }
 0x2c2   : > { %1385 = vmatpush3.bf16.msra.mxu1 %v1522_v5  ;;  %1308 = vmatprep.mubr.msk.f32.mxu1 %vm1445_vm1, %v1446_v7 }
 0x2c3   : > { %1386 = vmatprep.subr.bf16.mxu1 %v1444_v4 }
 0x2c6   : > { %1388 = vmatpush3.bf16.msra.mxu1 %v1533_v8 }
 0x2c7   : > { %1395 = vmatprep.subr.bf16.mxu1 %v1444_v4 }
 0x2c8   : > { %v934_v55 = vld [vmem:[#allocation3 + $0x10] sm:$0xff] }
 0x394   : > { %v608_v31 = vpop.f32.mrb[4].mxu1 }
 0x395   : > { %v612_v32 = vadd.f32 %v608_v31, %v538_v30  ;;  %v1288_v33 = vpop.f32.mrb[5].mxu1 }
 0x397   : > { %1426 = vtanh.f32 %v612_v32 }
 0x3a1   : > { %v1427_v34 = vpop.eup %1426 }
 0x3a2   : > { %614 = vst.msk [vmem:[#allocation3 + $0x18] sm:$0xff] %vm301_vm2, %v1427_v34  ;;  %1298 = vmatmul.mubr.msk.f32.vlgmr.msra.gmra.mrb[2].mxu0 %vm301_vm2, %v1427_v34 }
 0x3a3   : > { %1391 = vmatpush3.bf16.msra.mxu0 %v1522_v5  ;;  %1319 = vmatprep.mubr.msk.f32.mxu0 %vm1445_vm1, %v1446_v7 }
 0x3a4   : > { %1392 = vmatprep.subr.bf16.mxu0 %v1444_v4 }
 0x3a7   : > { %1394 = vmatpush3.bf16.msra.mxu0 %v1533_v8 }
 0x3a8   : > { %1402 = vmatprep.subr.bf16.mxu0 %v1401_v43 }
 0x3a9   : > { %v935_v56 = vld [vmem:[#allocation3 + $0x18] sm:$0xff] }
 0x475   : > { %v687_v37 = vpop.f32.mrb[2].mxu0 }
 0x476   : > { %v691_v38 = vadd.f32 %v687_v37, %v617_v36  ;;  %v1299_v39 = vpop.f32.mrb[3].mxu0 }
 0x478   : > { %1428 = vtanh.f32 %v691_v38 }
 0x482   : > { %v1429_v40 = vpop.eup %1428 }
 0x483   : > { %693 = vst.msk [vmem:[#allocation3 + $0x20] sm:$0xff] %vm301_vm2, %v1429_v40  ;;  %1309 = vmatmul.mubr.msk.f32.vlgmr.msra.gmra.mrb[6].mxu1 %vm301_vm2, %v1429_v40 }
 0x484   : > { %1397 = vmatpush3.bf16.msra.mxu1 %v1522_v5  ;;  %1330 = vmatprep.mubr.msk.f32.mxu1 %vm1445_vm1, %v1446_v7 }
 0x485   : > { %1398 = vmatprep.subr.bf16.mxu1 %v1444_v4 }
 0x488   : > { %1400 = vmatpush3.bf16.msra.mxu1 %v1533_v8 }
 0x48a   : > { %v936_v57 = vld [vmem:[#allocation3 + $0x20] sm:$0xff] }
 0x556   : > { %v766_v46 = vpop.f32.mrb[6].mxu1 }
 0x557   : > { %v770_v47 = vadd.f32 %v766_v46, %v696_v45  ;;  %v1310_v48 = vpop.f32.mrb[7].mxu1 }
 0x559   : > { %1430 = vtanh.f32 %v770_v47 }
 0x563   : > { %v1431_v52 = vpop.eup %1430 }
 0x564   : > { %772 = vst.msk [vmem:[#allocation3 + $0x28] sm:$0xff] %vm301_vm2, %v1431_v52  ;;  %1320 = vmatmul.mubr.msk.f32.vlgmr.msra.gmra.mrb[4].mxu0 %vm301_vm2, %v1431_v52 }
 0x565   : > { %1404 = vmatpush3.bf16.msra.mxu0 %v1401_v43  ;;  %1341 = vmatprep.mubr.msk.f32.mxu0 %vm301_vm2, %v932_v53 }
 0x566   : > { %1406 = vmatprep.subr.bf16.mxu0 %v1405_v51 }
 0x569   : > { %1408 = vmatpush3.bf16.msra.mxu0 %v1405_v51 }
 0x56b   : > { %v937_v58 = vld [vmem:[#allocation3 + $0x28] sm:$0xff] }
 0x56c   : > { %1342 = vmatmul.mubr.msk.f32.vlgmr.msra.gmra.mrb[6].mxu0 %vm301_vm2, %v933_v54 }
 0x56d   : > { %1344 = vmatprep.mubr.msk.f32.mxu0 %vm301_vm2, %v934_v55 }
 0x570   : > { %1345 = vmatmul.mubr.msk.f32.gmra.mrb[8].mxu0 %vm301_vm2, %v935_v56 }
 0x571   : > { %1347 = vmatprep.mubr.msk.f32.mxu0 %vm301_vm2, %v936_v57 }
 0x574   : > { %1348 = vmatmul.mubr.msk.f32.gmra.mrb[10].mxu0 %vm301_vm2, %v937_v58 }
 0x637   : > { %v845_v61 = vpop.f32.mrb[4].mxu0 }
 0x638   : > { %v849_v62 = vadd.f32 %v845_v61, %v775_v60  ;;  %v1321_v63 = vpop.f32.mrb[5].mxu0 }
 0x63a   : > { %1432 = vtanh.f32 %v849_v62 }
 0x63f   : > { %v1343_v1 = vpop.f32.mrb[6].mxu0 }
 0x640   : > { %v1047_v2 = vadd.f32 %v1343_v1, %v1181_v0  ;;  %v1041_v3 = vpop.f32.mrb[7].mxu0 }
 0x641   : > { %v1042_v4 = vadd.f32 %v1181_v0, %v1041_v3 }
 0x642   : > { %1081 = vst.msk [vmem:[%s1506_s10 + $0x8] sm:$0xff] %vm301_vm2, %v1047_v2 }
 0x643   : > { %1080 = vst.msk [vmem:[%s1506_s10] sm:$0xff] %vm301_vm2, %v1042_v4  ;;  %v1346_v5 = vpop.f32.mrb[8].mxu0 }
 0x644   : > { %v1433_v6 = vpop.eup %1432  ;;  %v1057_v7 = vadd.f32 %v1346_v5, %v1181_v0  ;;  %v1051_v8 = vpop.f32.mrb[9].mxu0 }
 0x645   : > { %851 = vst.msk [vmem:[#allocation3 + $0x30] sm:$0xff] %vm301_vm2, %v1433_v6  ;;  %v1052_v9 = vadd.f32 %v1181_v0, %v1051_v8  ;;  %1331 = vmatmul.mubr.msk.f32.vlgmr.msra.gmra.mrb[8].mxu1 %vm301_vm2, %v1433_v6 }
 0x646   : > { %1083 = vst.msk [vmem:[%s1506_s10 + $0x18] sm:$0xff] %vm301_vm2, %v1057_v7 }
 0x647   : > { %1082 = vst.msk [vmem:[%s1506_s10 + $0x10] sm:$0xff] %vm301_vm2, %v1052_v9  ;;  %v1349_v11 = vpop.f32.mrb[10].mxu0 }
 0x648   : > { %v1067_v12 = vadd.f32 %v1349_v11, %v1181_v0  ;;  %v1061_v13 = vpop.f32.mrb[11].mxu0 }
 0x649   : > { %v1062_v14 = vadd.f32 %v1181_v0, %v1061_v13 }
 0x64a   : > { %1085 = vst.msk [vmem:[%s1506_s10 + $0x28] sm:$0xff] %vm301_vm2, %v1067_v12 }
 0x64b   : > { %1084 = vst.msk [vmem:[%s1506_s10 + $0x20] sm:$0xff] %vm301_vm2, %v1062_v14 }
 0x64c   : > { %v938_v15 = vld [vmem:[#allocation3 + $0x30] sm:$0xff] }
 0x64d   : > { %1350 = vmatprep.mubr.msk.f32.mxu0 %vm301_vm2, %v938_v15 }
 0x718   : > { %v924_v18 = vpop.f32.mrb[8].mxu1 }
 0x719   : > { %v928_v19 = vadd.f32 %v924_v18, %v854_v17  ;;  %v1332_v20 = vpop.f32.mrb[9].mxu1 }
 0x71b   : > { %1434 = vtanh.f32 %v928_v19 }
 0x725   : > { %v1435_v21 = vpop.eup %1434 }
 0x726   : > { %930 = vst.msk [vmem:[#allocation3 + $0x38] sm:$0xff] %vm301_vm2, %v1435_v21  ;;  %931 = vst.msk [vmem:[#allocation2] sm:$0xff] %vm301_vm2, %v1435_v21 }
 0x727   : > { %1092 = vst.msk [vmem:[%s1668_s7] sm:$0xff] (!%p1190_p5), %vm301_vm2, %v1435_v21 }
 0x72d   : > { %v939_v22 = vld [vmem:[#allocation3 + $0x38] sm:$0xff] }
 0x72e   : > { %1351 = vmatmul.mubr.msk.f32.gmra.mrb[12].mxu0 %vm301_vm2, %v939_v22 }
 0x7ff   : > { %1091 = sbr.rel (%p1190_p5) target bundleno = 2054 (0x806), region = 52 }
 0x801   : > { %v1352_v23 = vpop.f32.mrb[12].mxu0 }
 0x802   : > { %v1077_v24 = vadd.f32 %v1352_v23, %v1181_v0  ;;  %v1071_v25 = vpop.f32.mrb[13].mxu0 }
 0x803   : > { %v1072_v26 = vadd.f32 %v1181_v0, %v1071_v25 }
 0x804   : > { %1087 = vst.msk [vmem:[%s1506_s10 + $0x38] sm:$0xff] %vm301_vm2, %v1077_v24 }
 0x805   : > { %1086 = vst.msk [vmem:[%s1506_s10 + $0x30] sm:$0xff] %vm301_vm2, %v1072_v26 }
 0x806 PF: > { %s18_s24 = sadd.s32 1, %s1442_s24  }
 0x807   : > { %p15_p6 = scmp.ge.s32.totalorder %s18_s24, 4  }
 0x809   :  { %17 = sbr.rel (!%p15_p6) target bundleno = 1 (0x1), region = 97 }

</bundles_post_ra>
